<compile_context>
chip_gen: v6e
topology: v6e:2x2x1
jax: 0.10.0
libtpu: 0.0.40
codegen_flags: <defaults>
</compile_context>

<pallas_src>
import functools

import jax
import jax.numpy as jnp
from jax.experimental import pallas as pl
from jax.experimental.pallas import tpu as pltpu

_MIB = 1024 * 1024
_NEG_BIG = -1e30  # effectively -inf for masked (padded) classes


# --------------------------------------------------------------------------- #
# Kernel
# --------------------------------------------------------------------------- #
def ce_kernel(emb_ref, w_ref, lbl_ref, out_ref, m_sc, s_sc, c_sc, *,
              c_tile, num_classes, c_padded):
    j = pl.program_id(1)  # C-tile index (reduction axis, innermost)

    @pl.when(j == 0)
    def _init():
        m_sc[...] = jnp.full_like(m_sc, -jnp.inf)
        s_sc[...] = jnp.zeros_like(s_sc)
        c_sc[...] = jnp.zeros_like(c_sc)

    # (tB, tC) logits tile: contract embeddings (tB, E) against weight (tC, E)
    # directly on E (transposed RHS is native on the MXU); accumulate in f32.
    logits = jax.lax.dot_general(
        emb_ref[...], w_ref[...],
        dimension_numbers=(((1,), (1,)), ((), ())),
        preferred_element_type=jnp.float32,
    )

    # TODO(synk): `loss_function` in the PyTorch module is an arbitrary user
    # callable applied to the logits before CE; synthetic choice here is identity.

    local_col = jax.lax.broadcasted_iota(jnp.int32, logits.shape, 1)  # (tB, tC)

    if c_padded:
        # Only the last C-tile can contain padded classes; keep them out of the LSE.
        logits = jnp.where(local_col < (num_classes - j * c_tile), logits, _NEG_BIG)

    # Online logsumexp update (all post-matmul math kept in f32).
    m_prev = m_sc[...]                                                # (tB, 1)
    m_new = jnp.maximum(m_prev, jnp.max(logits, axis=-1, keepdims=True))
    alpha = jnp.exp(m_prev - m_new)                                   # rescale old sum
    p_sum = jnp.sum(jnp.exp(logits - m_new), axis=-1, keepdims=True)

    # Correct-class logit, fused into the same pass over the logits tile.
    # Compare against the shifted label ((tB,1) op) instead of shifting the iota.
    hit = local_col == (lbl_ref[...] - j * c_tile)                    # (tB, tC)
    correct_part = jnp.sum(jnp.where(hit, logits, 0.0), axis=-1, keepdims=True)

    s_sc[...] = alpha * s_sc[...] + p_sum
    c_sc[...] = c_sc[...] + correct_part
    m_sc[...] = m_new

    @pl.when(j == pl.num_programs(1) - 1)
    def _finalize():
        out_ref[...] = m_sc[...] + jnp.log(s_sc[...]) - c_sc[...]     # per-row CE


# --------------------------------------------------------------------------- #
# Tiling / VMEM heuristics
# --------------------------------------------------------------------------- #
def _round_up(x, m):
    return ((x + m - 1) // m) * m


def _round_down(x, m):
    return max(m, (x // m) * m)


def _vmem_capacity_bytes():
    """Physical VMEM of the local chip; conservative (v7x, 64 MiB) fallback."""
    try:
        cap = getattr(pltpu.get_tpu_info(), "vmem_capacity_bytes", None)
        if cap:
            return int(cap)
    except Exception:
        pass
    return 64 * _MIB


def _num_tensorcores():
    """TensorCores sharing the megacore grid; 1 if undetectable."""
    try:
        dev = jax.devices()[0]
        for name in ("num_cores", "core_count", "num_tensorcores"):
            val = getattr(dev, name, None)
            if isinstance(val, int) and 1 <= val <= 8:
                return val
    except Exception:
        pass
    return 1


def _choose_tiles(B, E, C, itemsize, n_cores, budget):
    # b_tile: as large as possible (weight HBM traffic scales with n_b), but the
    # resident embeddings tile + lane-padded per-row buffers (labels/out/m/s/c)
    # must stay within ~budget/4, and at least n_cores B-tiles so no core idles.
    per_row_bytes = E * itemsize + 6 * 128 * 4   # emb row + ~6 lane-padded (.,1) rows
    b_cap = max(8, min(_round_down((budget // 4) // per_row_bytes, 8), 4096))
    n_b = max(n_cores, pl.cdiv(B, b_cap))
    b_tile = _round_up(pl.cdiv(B, n_b), 8)

    # c_tile: multiple of 128; cap by (a) the f32 logits tile (+ temporaries)
    # staying ~2 MiB and (b) a double-buffered weight tile <= budget/2.
    c_cap_logits = (2 * _MIB) // (4 * b_tile)
    c_cap_weight = (budget // 2) // max(1, 2 * E * itemsize)
    c_tile = _round_down(min(c_cap_logits, c_cap_weight, _round_up(C, 128)), 128)
    n_c = pl.cdiv(C, c_tile)
    return b_tile, n_b, c_tile, n_c


def _block_spec(shape, index_map, buffers=None):
    """BlockSpec with an optional pipeline buffer count (graceful fallback)."""
    if buffers is not None:
        try:
            return pl.BlockSpec(shape, index_map, pipeline_mode=pl.Buffered(buffers))
        except Exception:   # older jax without pipeline_mode / Buffered
            pass
    return pl.BlockSpec(shape, index_map)


# --------------------------------------------------------------------------- #
# Wrapper
# --------------------------------------------------------------------------- #
def my_ce_0_loss(embeddings, labels, weight, *, b_tile=None, c_tile=None,
                 compute_dtype=jnp.bfloat16):
    """embeddings: (B, E), labels: (B,) int, weight: (C, E) -> scalar f32 loss.

    compute_dtype controls the MXU input stream (bf16 by default, per perf
    review; the matmul always accumulates in f32).  Pass jnp.float32 for
    f32-faithful logits matching torch's autocast(False) linear.
    """
    B, E = embeddings.shape
    C, E2 = weight.shape
    assert E == E2, (E, E2)

    itemsize = jnp.dtype(compute_dtype).itemsize
    n_cores = _num_tensorcores()
    capacity = _vmem_capacity_bytes()
    # Scoped VMEM limit ~70% of physical: ~45 MiB (v7x 64 MiB), ~90 MiB (v5e/v6e).
    budget = min(max((capacity * 7) // 10, 32 * _MIB), 100 * _MIB)

    auto_b, n_b, auto_c, n_c = _choose_tiles(B, E, C, itemsize, n_cores, budget)
    if b_tile is None:
        b_tile = auto_b
    else:
        b_tile = _round_up(int(b_tile), 8)
        n_b = pl.cdiv(B, b_tile)
    if c_tile is None:
        c_tile = auto_c
    else:
        c_tile = _round_up(int(c_tile), 128)
        n_c = pl.cdiv(C, c_tile)

    B_pad = n_b * b_tile
    C_pad = n_c * c_tile

    # Cast once in the wrapper; pad ragged axes (padded classes are masked to a
    # large negative value in-kernel, padded rows are dropped before the mean).
    emb_in = embeddings.astype(compute_dtype)
    w_in = weight.astype(compute_dtype)
    lbl_in = labels.astype(jnp.int32).reshape(B, 1)
    if B_pad != B:
        emb_in = jnp.pad(emb_in, ((0, B_pad - B), (0, 0)))
        lbl_in = jnp.pad(lbl_in, ((0, B_pad - B), (0, 0)))
    if C_pad != C:
        w_in = jnp.pad(w_in, ((0, C_pad - C), (0, 0)))

    kernel = functools.partial(
        ce_kernel, c_tile=c_tile, num_classes=C, c_padded=(C_pad != C))

    per_row = pl.pallas_call(
        kernel,
        out_shape=jax.ShapeDtypeStruct((B_pad, 1), jnp.float32),
        grid_spec=pltpu.PrefetchScalarGridSpec(
            num_scalar_prefetch=0,
            grid=(n_b, n_c),  # reduction axis (C) last / innermost
            in_specs=[
                # embeddings: resident per B-tile -> single-buffered.
                _block_spec((b_tile, E), lambda i, j: (i, 0), buffers=1),
                # weight: streamed C-tiles in native (C, E) layout, double-buffered.
                _block_spec((c_tile, E), lambda i, j: (j, 0), buffers=None),
                # labels: resident per B-tile -> single-buffered.
                _block_spec((b_tile, 1), lambda i, j: (i, 0), buffers=1),
            ],
            out_specs=pl.BlockSpec((b_tile, 1), lambda i, j: (i, 0)),
            scratch_shapes=[pltpu.VMEM((b_tile, 1), jnp.float32)] * 3,  # m, sum, correct
        ),
        compiler_params=pltpu.CompilerParams(
            dimension_semantics=("parallel", "arbitrary"),
            vmem_limit_bytes=int(budget),
        ),
    )(emb_in, w_in, lbl_in)

    # CrossEntropyLoss default reduction='mean' -- tiny O(B) reduce in JAX.
    return jnp.mean(per_row[:B, 0])


# --------------------------------------------------------------------------- #
# Self-check
# --------------------------------------------------------------------------- #
if __name__ == "__main__":
    key = jax.random.PRNGKey(0)
    k_emb, k_w, k_lbl = jax.random.split(key, 3)

    def ref_loss(emb, lbl, w):
        logits = emb @ w.T
        lse = jax.nn.logsumexp(logits, axis=-1)
        return jnp.mean(lse - logits[jnp.arange(emb.shape[0]), lbl])

    # --- Check 1: aligned shapes, small explicit tiles so the multi-tile
    # online-logsumexp path is exercised: grid = (2 B-tiles, 4 C-tiles).
    B, E, C = 16, 128, 512
    embeddings = jax.random.normal(k_emb, (B, E), dtype=jnp.float32)
    weight = 0.01 * jax.random.normal(k_w, (C, E), dtype=jnp.float32)  # torch.normal(0, 0.01, (C, E))
    labels = jax.random.randint(k_lbl, (B,), 0, C, dtype=jnp.int32)
    expected = ref_loss(embeddings, labels, weight)

    # exact-f32 stream (matches torch autocast(False) linear)
    loss_f32 = jax.block_until_ready(jax.jit(functools.partial(
        my_ce_0_loss, b_tile=8, c_tile=128, compute_dtype=jnp.float32))(
            embeddings, labels, weight))
    assert jnp.allclose(loss_f32, expected, rtol=1e-4, atol=1e-4), (loss_f32, expected)

    # default bf16 stream (f32 accumulation)
    loss_bf16 = jax.block_until_ready(jax.jit(functools.partial(
        my_ce_0_loss, b_tile=8, c_tile=128))(embeddings, labels, weight))
    assert jnp.allclose(loss_bf16, expected, rtol=2e-2, atol=2e-2), (loss_bf16, expected)

    # --- Check 2: ragged B / C with explicit small tiles (exercises B padding,
    # in-kernel class masking, and the multi-tile reduction simultaneously).
    B2, E2, C2 = 13, 128, 500
    emb2 = jax.random.normal(k_emb, (B2, E2), dtype=jnp.float32)
    w2 = 0.01 * jax.random.normal(k_w, (C2, E2), dtype=jnp.float32)
    lbl2 = jax.random.randint(k_lbl, (B2,), 0, C2, dtype=jnp.int32)
    expected2 = ref_loss(emb2, lbl2, w2)

    loss2 = jax.block_until_ready(jax.jit(functools.partial(
        my_ce_0_loss, b_tile=8, c_tile=128))(emb2, lbl2, w2))
    assert jnp.allclose(loss2, expected2, rtol=2e-2, atol=2e-2), (loss2, expected2)

    # --- Check 3: same ragged shapes with fully automatic tile/VMEM selection.
    loss3 = jax.block_until_ready(jax.jit(my_ce_0_loss)(emb2, lbl2, w2))
    assert jnp.allclose(loss3, expected2, rtol=2e-2, atol=2e-2), (loss3, expected2)

    print("KERNEL_OK")
</pallas_src>

<mosaic_0001>
module attributes {stable_mosaic.version = 11 : i64} {
  func.func @ce_kernel(%arg0: i32, %arg1: i32, %arg2: memref<8x128xf32, #tpu.memory_space<vmem>>, %arg3: memref<128x128xf32, #tpu.memory_space<vmem>>, %arg4: memref<8x1xi32, #tpu.memory_space<vmem>>, %arg5: memref<8x1xf32, #tpu.memory_space<vmem>>, %arg6: memref<8x1xf32, #tpu.memory_space<vmem>>, %arg7: memref<8x1xf32, #tpu.memory_space<vmem>>, %arg8: memref<8x1xf32, #tpu.memory_space<vmem>>) attributes {dimension_semantics = [#tpu.dimension_semantics<parallel>, #tpu.dimension_semantics<arbitrary>], iteration_bounds = array<i64: 2, 4>, scalar_prefetch = 0 : i64, scratch_operands = 3 : i64, tpu.core_type = #tpu.core_type<tc>, window_params = [{pipeline_mode = #tpu.pipeline_mode<synchronous>, transform_indices = @transform_0, window_bounds = array<i64: 8, 128>}, {transform_indices = @transform_1, window_bounds = array<i64: 128, 128>}, {pipeline_mode = #tpu.pipeline_mode<synchronous>, transform_indices = @transform_2, window_bounds = array<i64: 8, 1>}, {transform_indices = @transform_3, window_bounds = array<i64: 8, 1>}]} {
    %c0_i32 = arith.constant 0 : i32
    %0 = arith.cmpi eq, %arg1, %c0_i32 : i32
    %1 = arith.extui %0 : i1 to i32
    %c0_i32_0 = arith.constant 0 : i32
    %2 = arith.cmpi ne, %1, %c0_i32_0 : i32
    scf.if %2 {
      %cst_23 = arith.constant 0xFF800000 : f32
      %39 = vector.broadcast %cst_23 : f32 to vector<8x1xf32>
      %c0_24 = arith.constant 0 : index
      %c0_25 = arith.constant 0 : index
      %40 = vector.load %arg6[%c0_24, %c0_25] : memref<8x1xf32, #tpu.memory_space<vmem>>, vector<8x1xf32>
      tpu.vector_store %arg6[%c0_24, %c0_25], %39 {strides = array<i32>} : memref<8x1xf32, #tpu.memory_space<vmem>>, vector<8x1xf32>,
      %cst_26 = arith.constant 0.000000e+00 : f32
      %41 = vector.broadcast %cst_26 : f32 to vector<8x1xf32>
      %c0_27 = arith.constant 0 : index
      %c0_28 = arith.constant 0 : index
      %42 = vector.load %arg7[%c0_27, %c0_28] : memref<8x1xf32, #tpu.memory_space<vmem>>, vector<8x1xf32>
      tpu.vector_store %arg7[%c0_27, %c0_28], %41 {strides = array<i32>} : memref<8x1xf32, #tpu.memory_space<vmem>>, vector<8x1xf32>,
      %cst_29 = arith.constant 0.000000e+00 : f32
      %43 = vector.broadcast %cst_29 : f32 to vector<8x1xf32>
      %c0_30 = arith.constant 0 : index
      %c0_31 = arith.constant 0 : index
      %44 = vector.load %arg8[%c0_30, %c0_31] : memref<8x1xf32, #tpu.memory_space<vmem>>, vector<8x1xf32>
      tpu.vector_store %arg8[%c0_30, %c0_31], %43 {strides = array<i32>} : memref<8x1xf32, #tpu.memory_space<vmem>>, vector<8x1xf32>,
    } else {
    }
    %c0 = arith.constant 0 : index
    %c0_1 = arith.constant 0 : index
    %3 = vector.load %arg2[%c0, %c0_1] : memref<8x128xf32, #tpu.memory_space<vmem>>, vector<8x128xf32>
    %c0_2 = arith.constant 0 : index
    %c0_3 = arith.constant 0 : index
    %4 = vector.load %arg3[%c0_2, %c0_3] : memref<128x128xf32, #tpu.memory_space<vmem>>, vector<128x128xf32>
    %cst = arith.constant dense<0.000000e+00> : vector<8x128xf32>
    %5 = tpu.matmul %3, %4, %cst {dimension_numbers = #tpu.dot_dimension_numbers<[1], [1], [0], [0], [0, 0, 1, 0], [], []>} : vector<8x128xf32>, vector<128x128xf32>, vector<8x128xf32> -> vector<8x128xf32>
    %6 = tpu.iota {dimensions = array<i32: 1>} : vector<8x128xi32>
    %c0_4 = arith.constant 0 : index
    %c0_5 = arith.constant 0 : index
    %7 = vector.load %arg6[%c0_4, %c0_5] : memref<8x1xf32, #tpu.memory_space<vmem>>, vector<8x1xf32>
    %cst_6 = arith.constant dense<0xFF800000> : vector<8xf32>
    %8 = vector.multi_reduction <maximumf>, %5, %cst_6 [1] : vector<8x128xf32> to vector<8xf32>
    %9 = vector.shape_cast %8 : vector<8xf32> to vector<8x1xf32>
    %10 = arith.maximumf %7, %9 : vector<8x1xf32>
    %11 = arith.subf %7, %10 : vector<8x1xf32>
    %12 = math.exp %11 : vector<8x1xf32>
    %13 = vector.broadcast %10 : vector<8x1xf32> to vector<8x128xf32>
    %14 = arith.subf %5, %13 : vector<8x128xf32>
    %15 = math.exp %14 : vector<8x128xf32>
    %cst_7 = arith.constant dense<0.000000e+00> : vector<8xf32>
    %16 = vector.multi_reduction <add>, %15, %cst_7 [1] : vector<8x128xf32> to vector<8xf32>
    %17 = vector.shape_cast %16 : vector<8xf32> to vector<8x1xf32>
    %c0_8 = arith.constant 0 : index
    %c0_9 = arith.constant 0 : index
    %18 = vector.load %arg4[%c0_8, %c0_9] : memref<8x1xi32, #tpu.memory_space<vmem>>, vector<8x1xi32>
    %c128_i32 = arith.constant 128 : i32
    %19 = arith.muli %arg1, %c128_i32 : i32
    %20 = vector.broadcast %19 : i32 to vector<8x1xi32>
    %21 = arith.subi %18, %20 : vector<8x1xi32>
    %22 = vector.broadcast %21 : vector<8x1xi32> to vector<8x128xi32>
    %23 = arith.cmpi eq, %6, %22 : vector<8x128xi32>
    %cst_10 = arith.constant 0.000000e+00 : f32
    %24 = vector.broadcast %cst_10 : f32 to vector<8x128xf32>
    %25 = arith.select %23, %5, %24 : vector<8x128xi1>, vector<8x128xf32>
    %cst_11 = arith.constant dense<0.000000e+00> : vector<8xf32>
    %26 = vector.multi_reduction <add>, %25, %cst_11 [1] : vector<8x128xf32> to vector<8xf32>
    %27 = vector.shape_cast %26 : vector<8xf32> to vector<8x1xf32>
    %c0_12 = arith.constant 0 : index
    %c0_13 = arith.constant 0 : index
    %28 = vector.load %arg7[%c0_12, %c0_13] : memref<8x1xf32, #tpu.memory_space<vmem>>, vector<8x1xf32>
    %29 = arith.mulf %12, %28 : vector<8x1xf32>
    %30 = arith.addf %29, %17 : vector<8x1xf32>
    %c0_14 = arith.constant 0 : index
    %c0_15 = arith.constant 0 : index
    %31 = vector.load %arg7[%c0_14, %c0_15] : memref<8x1xf32, #tpu.memory_space<vmem>>, vector<8x1xf32>
    tpu.vector_store %arg7[%c0_14, %c0_15], %30 {strides = array<i32>} : memref<8x1xf32, #tpu.memory_space<vmem>>, vector<8x1xf32>,
    %c0_16 = arith.constant 0 : index
    %c0_17 = arith.constant 0 : index
    %32 = vector.load %arg8[%c0_16, %c0_17] : memref<8x1xf32, #tpu.memory_space<vmem>>, vector<8x1xf32>
    %33 = arith.addf %32, %27 : vector<8x1xf32>
    %c0_18 = arith.constant 0 : index
    %c0_19 = arith.constant 0 : index
    %34 = vector.load %arg8[%c0_18, %c0_19] : memref<8x1xf32, #tpu.memory_space<vmem>>, vector<8x1xf32>
    tpu.vector_store %arg8[%c0_18, %c0_19], %33 {strides = array<i32>} : memref<8x1xf32, #tpu.memory_space<vmem>>, vector<8x1xf32>,
    %c0_20 = arith.constant 0 : index
    %c0_21 = arith.constant 0 : index
    %35 = vector.load %arg6[%c0_20, %c0_21] : memref<8x1xf32, #tpu.memory_space<vmem>>, vector<8x1xf32>
    tpu.vector_store %arg6[%c0_20, %c0_21], %10 {strides = array<i32>} : memref<8x1xf32, #tpu.memory_space<vmem>>, vector<8x1xf32>,
    %c3_i32 = arith.constant 3 : i32
    %36 = arith.cmpi eq, %arg1, %c3_i32 : i32
    %37 = arith.extui %36 : i1 to i32
    %c0_i32_22 = arith.constant 0 : i32
    %38 = arith.cmpi ne, %37, %c0_i32_22 : i32
    scf.if %38 {
      %c0_23 = arith.constant 0 : index
      %c0_24 = arith.constant 0 : index
      %39 = vector.load %arg6[%c0_23, %c0_24] : memref<8x1xf32, #tpu.memory_space<vmem>>, vector<8x1xf32>
      %c0_25 = arith.constant 0 : index
      %c0_26 = arith.constant 0 : index
      %40 = vector.load %arg7[%c0_25, %c0_26] : memref<8x1xf32, #tpu.memory_space<vmem>>, vector<8x1xf32>
      %41 = math.log %40 : vector<8x1xf32>
      %42 = arith.addf %39, %41 : vector<8x1xf32>
      %c0_27 = arith.constant 0 : index
      %c0_28 = arith.constant 0 : index
      %43 = vector.load %arg8[%c0_27, %c0_28] : memref<8x1xf32, #tpu.memory_space<vmem>>, vector<8x1xf32>
      %44 = arith.subf %42, %43 : vector<8x1xf32>
      %c0_29 = arith.constant 0 : index
      %c0_30 = arith.constant 0 : index
      %45 = vector.load %arg5[%c0_29, %c0_30] : memref<8x1xf32, #tpu.memory_space<vmem>>, vector<8x1xf32>
      tpu.vector_store %arg5[%c0_29, %c0_30], %44 {strides = array<i32>} : memref<8x1xf32, #tpu.memory_space<vmem>>, vector<8x1xf32>,
    } else {
    }
    return
  }
  func.func @transform_0(%arg0: i32, %arg1: i32) -> (i32, i32) {
    %c0_i32 = arith.constant 0 : i32
    %c0_i32_0 = arith.constant 0 : i32
    return %arg0, %c0_i32 : i32, i32
  }
  func.func @transform_1(%arg0: i32, %arg1: i32) -> (i32, i32) {
    %c0_i32 = arith.constant 0 : i32
    %c0_i32_0 = arith.constant 0 : i32
    return %arg1, %c0_i32 : i32, i32
  }
  func.func @transform_2(%arg0: i32, %arg1: i32) -> (i32, i32) {
    %c0_i32 = arith.constant 0 : i32
    %c0_i32_0 = arith.constant 0 : i32
    return %arg0, %c0_i32 : i32, i32
  }
  func.func @transform_3(%arg0: i32, %arg1: i32) -> (i32, i32) {
    %c0_i32 = arith.constant 0 : i32
    %c0_i32_0 = arith.constant 0 : i32
    return %arg0, %c0_i32 : i32, i32
  }
}

</mosaic_0001>

<bundles_post_ra>
// kernel: my_ce_0_loss.1
= control target key start
LH: loop header
LB: loop body
LE: loop exit
PB: predicated region body
PF: predicated region fallthrough
CT: control target
= control target key end

     0   :  { %8 = vsyncpa [#allocation6], 0  ;;  %s930_s0 = inlined_call_operand.vmem [shape: f32[16,128], index: 0, kind: input, shape index: {}]   ;;  %s931_s1 = inlined_call_operand.hbm [shape: f32[512,128], index: 1, kind: input, shape index: {}]   ;;  %s932_s2 = inlined_call_operand.vmem [shape: s32[16,1], index: 2, kind: input, shape index: {}]   ;;  %s933_s3 = inlined_call_operand.vmem [shape: f32[16,1], index: 3, kind: output, shape index: {}]  }
   0x1   :  { %10 = vsyncpa [#allocation6 + $0x1], 0  ;;  %s768_s12 = smov 0   ;;  %s770_s13 = smov 0  }
   0x2   :  { %s772_s14 = smov 0   ;;  %s774_s15 = smov 0  }
   0x3   :  { %s776_s16 = smov 0   ;;  %s778_s17 = smov 0  }
   0x4   :  { %s780_s18 = smov 0   ;;  %s782_s19 = smov 0  }
   0x5 LB: > { %s488_s20 = sadd.s32 4294967295, %s738_s19   ;;  %s25_s21 = sadd.s32 1, %s730_s17  ;;  %s738_s19 = sphi %s782_s19, %s16_s19   ;;  %s734_s18 = sphi %s780_s18, %s943_s18   ;;  %s730_s17 = sphi %s778_s17, %s942_s17   ;;  %s726_s16 = sphi %s776_s16, %s941_s16   ;;  %s722_s15 = sphi %s774_s15, %s940_s15   ;;  %s718_s14 = sphi %s772_s14, %s939_s14   ;;  %s714_s13 = sphi %s770_s13, %s938_s13   ;;  %s710_s12 = sphi %s768_s12, %s937_s12  }
   0x6   : > { %p26_p0 = scmp.ge.s32.totalorder %s25_s21, 4  ;;  %s28_s22 = sadd.s32 1, %s734_s18 }
   0x7   : > { %s61_s23 = sadd.s32 1, %s718_s14  ;;  %p68_p1 = scmp.ne.s32.totalorder %s718_s14, %s714_s13 }
   0x8   : > { %s945_s21 = smov (%p26_p0, %s25_s21), 0  ;;  %s947_s22 = smov (!%p26_p0, %s28_s22), %s734_s18 }
   0x9   : > { %s58_s24 = ssub.s32 %s730_s17, %s945_s21  ;;  %p69_p2 = scmp.eq.s32.totalorder %s738_s19, 0 }
   0xa   : > { %p30_p3 = scmp.ge.s32.totalorder %s947_s22, 2  ;;  %p59_p4 = scmp.eq.s32.totalorder %s58_s24, 0 }
   0xb   : > { %p818_p5 = por %p69_p2, %p68_p1  ;;  %p74_p6 = scmp.ne.s32.totalorder %s714_s13, %s710_s12 }
   0xc   : > { %s949_s22 = smov (%p30_p3, %s947_s22), 0  ;;  %p75_p7 = scmp.eq.s32.totalorder %s488_s20, 0 }
   0xd   : > { %s826_s26 = scalar_select %p59_p4, %s718_s14, %s61_s23  }
   0xe   : > { %p564_p8 = scmp.lt.s32.totalorder %s738_s19, 8  ;;  %s164_s27 = sand.u32 1, %s718_s14  }
   0xf   : > { %p830_p9 = por %p75_p7, %p74_p6  ;;  %s492_s29 = sshll.u32 %s164_s27, 7 }
  0x10   : > { %s505_s30 = sshll.u32 %s730_s17, 11  ;;  %s168_s7 = scalar_lea.vmem [#allocation5], %s492_s29 }
  0x11   : > { %s174_s6 = scalar_lea.hbm %s931_s1, %s505_s30  ;;  %s175_s8 = sshll.u32 %s168_s7, 4  ;;  %s176_s8 = int_to_ptr.vmem [resolvable:$true] %s175_s8 }
  0x12   : > { %p840_p10 = pnand %p564_p8, %p818_p5  ;;  %s165_s10 = scalar_lea.sflag [#allocation6], %s164_s27 }
  0x13   : > { %s657_s11 = scalar_lea.vmem %s176_s8, 2048  ;;  %s740_s12 = smov [#allocation5]  }
  0x14   : > { %p646_p11 = pneg %p840_p10  ;;  %p658_p12 = scmp.ne.s32.totalorder %s176_s8, %s657_s11 }
  0x15   : > { %s662_s20 = sshll.u32 %s740_s12, 4  ;;  %s663_s20 = int_to_ptr.vmem [resolvable:$false] %s662_s20 }
  0x16   : > { %p660_p13 = pnand %p658_p12, %p646_p11  ;;  %s664_s23 = scalar_lea.vmem %s663_s20, 4096 }
  0x17   : > { %p665_p1 = scmp.lt.s32.totalorder %s176_s8, %s663_s20  ;;  %p666_p2 = scmp.lt.s32.totalorder %s664_s23, %s657_s11 }
  0x18   : > { %p661_p0 = pneg %p660_p13 }
  0x19   : > { %p667_p3 = por %p666_p2, %p665_p1 }
  0x1b   : > { %p668_p4 = pnand %p667_p3, %p661_p0 }
  0x1d   : > { %671 = shalt.err (!%p668_p4)
}
  0x1e   : > { %s741_s24 = smov 128   ;;  %s742_s25 = smov 8  }
  0x1f   : > { %563 = dma.hbm_to_vmem [thread:$0]  (!%p840_p10), %s174_s6, 2048, %s176_s8, %s165_s10, %s741_s24, %s741_s24, %s742_s25  }
  0x20   : > { %p495_p5 = scmp.ge.s32.totalorder %s738_s19, 1  ;;  %p183_p6 = scmp.lt.s32.totalorder %s738_s19, 9 }
  0x22   : > { %p184_p7 = pnand %p495_p5, %p183_p6 }
  0x23   : > { %s189_s27 = sand.u32 (!%p184_p7), 1, %s714_s13  }
  0x24   : > { %187 = sbr.rel (%p184_p7) target bundleno = 761 (0x2f9), region = 32  ;;  %s496_s29 = sshll.u32 (!%p184_p7), %s189_s27, 7 }
  0x25   : > { %s190_s30 = scalar_lea.sflag (!%p184_p7), [#allocation6], %s189_s27  ;;  %s851_s4 = scalar_lea.vmem (!%p184_p7), [#allocation5], %s496_s29 }
  0x29   : > { %705 = dma.done.wait (%p830_p9), %s190_s30, 2048  }
  0x2a   : > { %707 = vsyncadd (%p830_p9), %s190_s30, 4294965248  ;;  %p223_p8 = scmp.lt.s32.totalorder %s726_s16, 1  ;;  %p500_p9 = scmp.ne.s32.totalorder %s722_s15, 0 }
  0x2c   : > { %s951_s16 = smov (!%p223_p8, %s726_s16), 1  ;;  %239 = sbr.rel (%p500_p9) target bundleno = 52 (0x34), region = 40 }
  0x2d   : > { %s859_s5 = sshll.u32 %s951_s16, 3 }
  0x2e   : > { %s226_s8 = scalar_lea.vmem %s930_s0, %s859_s5  ;;  %s231_s11 = scalar_lea.vmem %s932_s2, %s859_s5 }
  0x2f   : > { %s235_s20 = scalar_lea.vmem %s933_s3, %s859_s5 }
  0x31   : > { %vm240_vm0 = vcmask 7168   ;;  %v743_v0 = vmov -inf   ;;  %v744_v1 = vmov 0.0  }
  0x32   : > { %241 = vst.msk [vmem:[#allocation2] sm:$0xff] %vm240_vm0, %v743_v0  ;;  %242 = vst.msk [vmem:[#allocation3] sm:$0xff] %vm240_vm0, %v744_v1 }
  0x33   : > { %243 = vst.msk [vmem:[#allocation4] sm:$0xff] %vm240_vm0, %v744_v1 }
  0x34 PF: > { %v260_v2 = vld [vmem:[%s851_s4 + $0x78] sm:$0xff]  ;;  %v745_v3 = vmov 0.0   ;;  %vm746_vm1 = vmmov 0   ;;  %s501_s16 = sshll.u32 %s722_s15, 7  ;;  %v747_v4 = vmov 0   ;;  %v259_v5 = vld [vmem:[%s851_s4 + $0x70] sm:$0xff]  ;;  %v331_v33 = vlaneseq }
  0x35   : > { %523 = vmatprep.subr.mxu0 %v745_v3  ;;  %555 = vmatprep.mubr.msk.f32.mxu0 %vm746_vm1, %v745_v3  ;;  %v352_v6 = vstv %s501_s16  ;;  %v350_v7 = vld [vmem:[%s231_s11] sm:$0xff]  ;;  %v257_v10 = vld [vmem:[%s851_s4 + $0x60] sm:$0xff]  ;;  %v256_v11 = vld [vmem:[%s851_s4 + $0x58] sm:$0xff]  ;;  %vm364_vm2 = vcmask 7168   ;;  %p502_p10 = scmp.ne.s32.totalorder %s722_s15, 3 }
  0x36   : > { %524 = vmatpush3.xpose.msra.mxu0 %v260_v2  ;;  %637 = vset.pattern.permute.xlu1 %v747_v4  ;;  %v353_v8 = vsub.s32 %v350_v7, %v352_v6  ;;  %v258_v9 = vld [vmem:[%s851_s4 + $0x68] sm:$0xff]  ;;  %v255_v12 = vld [vmem:[%s851_s4 + $0x50] sm:$0xff]  ;;  %v253_v14 = vld [vmem:[%s851_s4 + $0x40] sm:$0xff]  ;;  %v332_v34 = vand.u32 127, %v331_v33 }
  0x37   : > { %525 = vmatprep.subr.mxu0 %v745_v3  ;;  %636 = vset.pattern.permute.xlu0 %v747_v4  ;;  %v254_v13 = vld [vmem:[%s851_s4 + $0x48] sm:$0xff]  ;;  %v252_v15 = vld [vmem:[%s851_s4 + $0x38] sm:$0xff]  ;;  %v251_v16 = vld [vmem:[%s851_s4 + $0x30] sm:$0xff] }
  0x38   : > { %355 = vperm.xlu1 %637, %v353_v8   ;;  %v250_v17 = vld [vmem:[%s851_s4 + $0x28] sm:$0xff]  ;;  %v249_v18 = vld [vmem:[%s851_s4 + $0x20] sm:$0xff]  ;;  %v248_v19 = vld [vmem:[%s851_s4 + $0x18] sm:$0xff] }
  0x39   : > { %v247_v20 = vld [vmem:[%s851_s4 + $0x10] sm:$0xff]  ;;  %v246_v21 = vld [vmem:[%s851_s4 + $0x8] sm:$0xff]  ;;  %v245_v22 = vld [vmem:[%s851_s4] sm:$0xff] }
  0x3a   : > { %526 = vmatpush3.xpose.msra.mxu0 %v259_v5  ;;  %v244_v23 = vld [vmem:[%s226_s8] sm:$0xff]  ;;  %v361_v40 = vld [vmem:[#allocation3] sm:$0xff]  ;;  %v366_v44 = vld [vmem:[#allocation4] sm:$0xff] }
  0x3b   : > { %527 = vmatprep.subr.mxu0 %v745_v3  ;;  %v333_v26 = vld [vmem:[#allocation2] sm:$0xff] }
  0x3e   : > { %528 = vmatpush3.xpose.msra.mxu0 %v258_v9 }
  0x3f   : > { %529 = vmatprep.subr.mxu0 %v745_v3 }
  0x42   : > { %530 = vmatpush3.xpose.msra.mxu0 %v257_v10 }
  0x43   : > { %531 = vmatprep.subr.mxu0 %v745_v3 }
  0x46   : > { %532 = vmatpush3.xpose.msra.mxu0 %v256_v11 }
  0x47   : > { %533 = vmatprep.subr.mxu0 %v745_v3 }
  0x4a   : > { %534 = vmatpush3.xpose.msra.mxu0 %v255_v12 }
  0x4b   : > { %535 = vmatprep.subr.mxu0 %v745_v3 }
  0x4e   : > { %536 = vmatpush3.xpose.msra.mxu0 %v254_v13 }
  0x4f   : > { %537 = vmatprep.subr.mxu0 %v745_v3 }
  0x52   : > { %538 = vmatpush3.xpose.msra.mxu0 %v253_v14 }
  0x53   : > { %539 = vmatprep.subr.mxu0 %v745_v3 }
  0x56   : > { %540 = vmatpush3.xpose.msra.mxu0 %v252_v15 }
  0x57   : > { %541 = vmatprep.subr.mxu0 %v745_v3 }
  0x5a   : > { %542 = vmatpush3.xpose.msra.mxu0 %v251_v16 }
  0x5b   : > { %543 = vmatprep.subr.mxu0 %v745_v3 }
  0x5e   : > { %544 = vmatpush3.xpose.msra.mxu0 %v250_v17 }
  0x5f   : > { %545 = vmatprep.subr.mxu0 %v745_v3 }
  0x62   : > { %546 = vmatpush3.xpose.msra.mxu0 %v249_v18 }
  0x63   : > { %547 = vmatprep.subr.mxu0 %v745_v3 }
  0x66   : > { %548 = vmatpush3.xpose.msra.mxu0 %v248_v19 }
  0x67   : > { %549 = vmatprep.subr.mxu0 %v745_v3 }
  0x6a   : > { %550 = vmatpush3.xpose.msra.mxu0 %v247_v20 }
  0x6b   : > { %551 = vmatprep.subr.mxu0 %v745_v3 }
  0x6e   : > { %552 = vmatpush3.xpose.msra.mxu0 %v246_v21 }
  0x6f   : > { %553 = vmatprep.subr.mxu0 %v745_v3 }
  0x72   : > { %554 = vmatpush3.xpose.msra.mxu0 %v245_v22 }
  0x75   : > { %556 = vmatmul.mubr.f32.vlgmr.msra.gmra.mxu0 %v244_v23 }
  0xb3   : > { %v356_v35 = vpop.permute.xlu1 %355 }
  0xb4   : > { %vm357_vm3 = vcmp.eq.s32.totalorder %v332_v34, %v356_v35 }
 0x135   : > { %v327_v24 = vpop.f32.mrf.mxu0 }
 0x136   : > { %334 = vmax.xlane.f32.xlu0 %v327_v24  ;;  %v358_v37 = vsel %vm357_vm3, %v327_v24, 0.0 }
 0x137   : > { %v557_v25 = vpop.f32.mrf.mxu0 }
 0x1bf   : > { %v335_v27 = vpop.xlane.xlu0 %334 }
 0x1c0   : > { %v336_v28 = vmax.f32 %v333_v26, %v335_v27 }
 0x1c2   : > { %v337_v29 = vsub.f32 %v333_v26, %v336_v28  ;;  %369 = vst.msk [vmem:[#allocation2] sm:$0xff] %vm364_vm2, %v336_v28  ;;  %342 = vperm.xlu0 %636, %v336_v28  }
 0x1c4   : > { %v338_v38 = vmul.f32 1.442695, %v337_v29 }
 0x23d   : > { %v343_v30 = vpop.permute.xlu0 %342 }
 0x23e   : > { %v345_v31 = vsub.f32 %v327_v24, %v343_v30 }
 0x240   : > { %v346_v32 = vmul.f32 1.442695, %v345_v31 }
 0x242   : > { %638 = vpow2.f32 %v346_v32 }
 0x243   : > { %640 = vpow2.f32 %v338_v38 }
 0x24f   : > { %v639_v36 = vpop.eup %638 }
 0x250   : > { %348 = vadd.xlane.f32.xlu1 %v639_v36  ;;  %v641_v39 = vpop.eup %640 }
 0x251   : > { %v362_v41 = vmul.f32 %v641_v39, %v361_v40 }
 0x254   : > { %359 = vadd.xlane.f32.xlu1 %v358_v37 }
 0x2d9   : > { %v349_v42 = vpop.xlane.xlu1 %348 }
 0x2da   : > { %v363_v43 = vadd.f32 %v362_v41, %v349_v42 }
 0x2dc   : > { %365 = vst.msk [vmem:[#allocation3] sm:$0xff] %vm364_vm2, %v363_v43  ;;  %373 = sbr.rel (%p502_p10) target bundleno = 761 (0x2f9), region = 44 }
 0x2dd   : > { %v360_v45 = vpop.xlane.xlu1 %359 }
 0x2de   : > { %v367_v46 = vadd.f32 %v366_v44, %v360_v45 }
 0x2e0   : > { %368 = vst.msk [vmem:[#allocation4] sm:$0xff] %vm364_vm2, %v367_v46 }
 0x2e1   : > { %v374_v49 = vld [vmem:[#allocation2] sm:$0xff] }
 0x2e3   : > { %v375_v47 = vld [vmem:[#allocation3] sm:$0xff] }
 0x2e4   : > { %642 = vlog2.f32 %v375_v47 }
 0x2e7   : > { %v379_v51 = vld [vmem:[#allocation4] sm:$0xff] }
 0x2f1   : > { %v643_v48 = vpop.eup %642 }
 0x2f2   : > { %v377_v50 = vmul.f32 0.6931472, %v643_v48 }
 0x2f4   : > { %v378_v52 = vadd.f32 %v377_v50, %v374_v49 }
 0x2f6   : > { %v380_v53 = vsub.f32 %v378_v52, %v379_v51 }
 0x2f8   : > { %381 = vst.msk [vmem:[%s235_s20] sm:$0xff] %vm364_vm2, %v380_v53 }
 0x2f9 PF: > { %s16_s19 = sadd.s32 1, %s738_s19   ;;  %s937_s12 = smov %s714_s13 }
 0x2fa   : > { %p13_p11 = scmp.ge.s32.totalorder %s16_s19, 10   ;;  %s938_s13 = smov %s718_s14 }
 0x2fb   : > { %s939_s14 = smov %s826_s26  ;;  %s940_s15 = smov %s730_s17 }
 0x2fc   : > { %s941_s16 = smov %s734_s18  ;;  %s942_s17 = smov %s945_s21 }
 0x2fd   : > { %s943_s18 = smov %s949_s22  ;;  %15 = sbr.rel (!%p13_p11) target bundleno = 5 (0x5), region = 86 }
 0x302   :  { %401 = vsyncpa [#allocation6], 1 }
 0x303   :  { %403 = vsyncpa [#allocation6 + $0x1], 1 }

</bundles_post_ra>
